<compile_context>
chip_gen: v7x
topology: tpu7x:2x2x1
jax: 0.10.0
libtpu: 0.0.40
codegen_flags: <defaults>
</compile_context>

<pallas_src>
import jax
import jax.numpy as jnp
from jax.experimental import pallas as pl
from jax.experimental.pallas import tpu as pltpu

IN_FEATURES = 64
OUT_FEATURES = 10

_VMEM_LIMIT_BYTES = 32 * 1024 * 1024  # safe on v5e/v6e/v7x; covers 16K-row tiles


# ----------------------------- Pallas kernel -----------------------------

def linear_kernel(x_ref, w_ref, b_ref, o_ref):
    # x_ref: (tm, 64)  w_ref: (64, 10)  b_ref: (1, 10)  o_ref: (tm, 10)
    o_ref[...] = (
        jnp.dot(x_ref[...], w_ref[...], preferred_element_type=jnp.float32)
        + b_ref[...]
    ).astype(o_ref.dtype)


# ----------------------------- tiling helpers -----------------------------

def _round_up(x, m):
    return ((x + m - 1) // m) * m


def _default_block_rows():
    # Pick a row tile large enough that per-step DMA time >> 0.35 us step overhead,
    # sized per HBM bandwidth of the chip generation.
    try:
        kind = jax.devices()[0].device_kind.lower()
    except Exception:
        kind = ""
    if "v5" in kind:
        return 4096      # ~820 GB/s HBM, 16 MiB scoped-VMEM default
    if "v6" in kind:
        return 8192      # ~1.4 TB/s HBM
    if "7" in kind:
        return 16384     # ~3.2 TB/s HBM per TC
    return 8192


def _pick_tile(n_rows, block_rows):
    if n_rows <= block_rows:
        return n_rows            # single step; block equals full array dim -> legal
    tm = block_rows
    # Keep >= 8 grid steps so each of the 2 TensorCores on v7x gets >= 4 steps.
    min_steps = 8
    if pl.cdiv(n_rows, tm) < min_steps:
        tm = min(block_rows, max(1024, _round_up(pl.cdiv(n_rows, min_steps), 8)))
    return tm


# ----------------------------- wrapper -----------------------------

def classifier_forward(x, params, *, block_rows=None):
    """x: (N, 64) f32 or bf16 -> (N, 10) float32  (== nn.Linear(64, 10))."""
    N, K = x.shape
    assert K == IN_FEATURES, x.shape

    if block_rows is None:
        block_rows = _default_block_rows()
    tm = _pick_tile(N, block_rows)
    grid = (pl.cdiv(N, tm),)

    w = params["w"].astype(x.dtype)          # (64, 10) == W.T
    b = params["b"]                          # (1, 10), f32

    cost = pl.CostEstimate(
        flops=2 * N * IN_FEATURES * OUT_FEATURES,
        transcendentals=0,
        bytes_accessed=(
            x.dtype.itemsize * (N * IN_FEATURES + IN_FEATURES * OUT_FEATURES)
            + 4 * (OUT_FEATURES + N * OUT_FEATURES)
        ),
    )

    return pl.pallas_call(
        linear_kernel,
        grid=grid,
        in_specs=[
            pl.BlockSpec((tm, IN_FEATURES), lambda i: (i, 0)),
            pl.BlockSpec((IN_FEATURES, OUT_FEATURES), lambda i: (0, 0)),
            pl.BlockSpec((1, OUT_FEATURES), lambda i: (0, 0)),
        ],
        out_specs=pl.BlockSpec((tm, OUT_FEATURES), lambda i: (i, 0)),
        out_shape=jax.ShapeDtypeStruct((N, OUT_FEATURES), jnp.float32),
        compiler_params=pltpu.CompilerParams(
            dimension_semantics=("parallel",),
            vmem_limit_bytes=_VMEM_LIMIT_BYTES,
        ),
        cost_estimate=cost,
    )(x, w, b)


# ----------------------------- params -----------------------------

def init_params(key):
    # Mirror PyTorch's default Linear init: U(-1/sqrt(fan_in), 1/sqrt(fan_in)).
    kw, kb = jax.random.split(key)
    bound = 1.0 / jnp.sqrt(jnp.float32(IN_FEATURES))
    w_pt = jax.random.uniform(kw, (OUT_FEATURES, IN_FEATURES), jnp.float32,
                              minval=-bound, maxval=bound)
    b_pt = jax.random.uniform(kb, (OUT_FEATURES,), jnp.float32,
                              minval=-bound, maxval=bound)
    return {
        "w": jnp.transpose(w_pt),          # (64, 10) == W.T
        "b": b_pt.reshape(1, OUT_FEATURES),
    }


if __name__ == "__main__":
    key = jax.random.PRNGKey(0)
    pkey, xkey = jax.random.split(key)
    params = init_params(pkey)

    # Forward implies x of shape (N, 64); small batch of 2 for the check.
    x = jax.random.normal(xkey, (2, IN_FEATURES), dtype=jnp.float32)

    out = jax.jit(classifier_forward)(x, params)
    out = jax.block_until_ready(out)

    assert out.shape == (2, OUT_FEATURES), out.shape
    assert bool(jnp.all(jnp.isfinite(out)))

    # Numerical check against the plain-JAX reference of nn.Linear(64, 10).
    ref = x @ params["w"] + params["b"]
    assert bool(jnp.allclose(out, ref, atol=1e-5, rtol=1e-5))

    print("KERNEL_OK")
</pallas_src>

<mosaic_0001>
module attributes {stable_mosaic.version = 11 : i64} {
  func.func @linear_kernel(%arg0: i32, %arg1: memref<2x64xf32, #tpu.memory_space<vmem>>, %arg2: memref<64x10xf32, #tpu.memory_space<vmem>>, %arg3: memref<1x10xf32, #tpu.memory_space<vmem>>, %arg4: memref<2x10xf32, #tpu.memory_space<vmem>>) attributes {dimension_semantics = [#tpu.dimension_semantics<parallel>], iteration_bounds = array<i64: 1>, scalar_prefetch = 0 : i64, scratch_operands = 0 : i64, tpu.core_type = #tpu.core_type<tc>, window_params = [{transform_indices = @transform_0, window_bounds = array<i64: 2, 64>}, {pipeline_mode = #tpu.pipeline_mode<synchronous>, transform_indices = @transform_1, window_bounds = array<i64: 64, 10>}, {pipeline_mode = #tpu.pipeline_mode<synchronous>, transform_indices = @transform_2, window_bounds = array<i64: 1, 10>}, {transform_indices = @transform_3, window_bounds = array<i64: 2, 10>}]} {
    %c0 = arith.constant 0 : index
    %c0_0 = arith.constant 0 : index
    %0 = vector.load %arg1[%c0, %c0_0] : memref<2x64xf32, #tpu.memory_space<vmem>>, vector<2x64xf32>
    %c0_1 = arith.constant 0 : index
    %c0_2 = arith.constant 0 : index
    %1 = vector.load %arg2[%c0_1, %c0_2] : memref<64x10xf32, #tpu.memory_space<vmem>>, vector<64x10xf32>
    %cst = arith.constant dense<0.000000e+00> : vector<2x10xf32>
    %2 = tpu.matmul %0, %1, %cst {dimension_numbers = #tpu.dot_dimension_numbers<[1], [0], [0], [1], [0, 0, 1, 1], [], []>} : vector<2x64xf32>, vector<64x10xf32>, vector<2x10xf32> -> vector<2x10xf32>
    %c0_3 = arith.constant 0 : index
    %c0_4 = arith.constant 0 : index
    %3 = vector.load %arg3[%c0_3, %c0_4] : memref<1x10xf32, #tpu.memory_space<vmem>>, vector<1x10xf32>
    %4 = vector.broadcast %3 : vector<1x10xf32> to vector<2x10xf32>
    %5 = arith.addf %2, %4 : vector<2x10xf32>
    %c0_5 = arith.constant 0 : index
    %c0_6 = arith.constant 0 : index
    %6 = vector.load %arg4[%c0_5, %c0_6] : memref<2x10xf32, #tpu.memory_space<vmem>>, vector<2x10xf32>
    tpu.vector_store %arg4[%c0_5, %c0_6], %5 {strides = array<i32>} : memref<2x10xf32, #tpu.memory_space<vmem>>, vector<2x10xf32>,
    return
  }
  func.func @transform_0(%arg0: i32) -> (i32, i32) {
    %c0_i32 = arith.constant 0 : i32
    %c0_i32_0 = arith.constant 0 : i32
    return %arg0, %c0_i32 : i32, i32
  }
  func.func @transform_1(%arg0: i32) -> (i32, i32) {
    %c0_i32 = arith.constant 0 : i32
    %c0_i32_0 = arith.constant 0 : i32
    %c0_i32_1 = arith.constant 0 : i32
    return %c0_i32, %c0_i32_0 : i32, i32
  }
  func.func @transform_2(%arg0: i32) -> (i32, i32) {
    %c0_i32 = arith.constant 0 : i32
    %c0_i32_0 = arith.constant 0 : i32
    %c0_i32_1 = arith.constant 0 : i32
    return %c0_i32, %c0_i32_0 : i32, i32
  }
  func.func @transform_3(%arg0: i32) -> (i32, i32) {
    %c0_i32 = arith.constant 0 : i32
    %c0_i32_0 = arith.constant 0 : i32
    return %arg0, %c0_i32 : i32, i32
  }
}

</mosaic_0001>

<bundles_post_ra>
// kernel: classifier_forward.1
= control target key start
LH: loop header
LB: loop body
LE: loop exit
PB: predicated region body
PF: predicated region fallthrough
CT: control target
= control target key end

     0   :  { %v191_v3 = vmov 0.0|0.0   ;;  %vm192_vm0 = vmmov 0   ;;  %v193_v6 = vmov 0.0   ;;  %s257_s0 = inlined_call_operand.vmem [shape: f32[2,64], index: 0, kind: input, shape index: {}]   ;;  %s258_s1 = inlined_call_operand.vmem [shape: f32[64,10], index: 1, kind: input, shape index: {}]   ;;  %s259_s2 = inlined_call_operand.vmem [shape: f32[1,10], index: 2, kind: input, shape index: {}]   ;;  %s260_s3 = inlined_call_operand.hbm [shape: f32[2,10], index: 3, kind: output, shape index: {}]  }
   0x1   :  { %v16_v0 = vld [vmem:[%s258_s1] sm:$0xff]  ;;  %v17_v1 = vld [vmem:[%s258_s1 + $0x8] sm:$0xff]  ;;  %v18_v2 = vld [vmem:[%s258_s1 + $0x10] sm:$0xff]  ;;  %151 = vmatprep.subr.bf16.mxu0 %v191_v3  ;;  %148 = vmatprep.mubr.msk.f32.mxu0 %vm192_vm0, %v193_v6 }
   0x2   :  { %v152_v4 = vpack.c.bf16 %v17_v1, %v16_v0  ;;  %v19_v5 = vld [vmem:[%s258_s1 + $0x18] sm:$0xff] }
   0x3   :  { %v155_v7 = vpack.c.bf16 %v19_v5, %v18_v2 }
   0x4   :  { %153 = vmatpush3.bf16.msra.mxu0 %v152_v4 }
   0x5   :  { %8 = vsyncpa [#allocation3], 0  ;;  %154 = vmatprep.subr.bf16.mxu0 %v191_v3  ;;  %v20_v8 = vld [vmem:[%s258_s1 + $0x20] sm:$0xff]  ;;  %v21_v9 = vld [vmem:[%s258_s1 + $0x28] sm:$0xff]  ;;  %vm31_vm1 = vcmask 523264   ;;  %s194_s5 = smov [#allocation2]  }
   0x6   :  { %v158_v10 = vpack.c.bf16 %v21_v9, %v20_v8  ;;  %v22_v11 = vld [vmem:[%s258_s1 + $0x30] sm:$0xff]  ;;  %v23_v12 = vld [vmem:[%s258_s1 + $0x38] sm:$0xff]  ;;  %v15_v14 = vld [vmem:[%s257_s0] sm:$0x3]  ;;  %s113_s6 = sshll.u32 %s194_s5, 4  ;;  %vm105_vm2 = vcmask 74752   ;;  %s114_s6 = int_to_ptr.vmem [resolvable:$true] %s113_s6 }
   0x7   :  { %v161_v13 = vpack.c.bf16 %v23_v12, %v22_v11  ;;  %v121_v15 = vld [vmem:[%s259_s2] ss:$0 sm:$0xff]  ;;  %s167_s1 = scalar_lea.vmem %s114_s6, 32  ;;  %p172_p1 = scmp.lt.s32.totalorder %s114_s6, %s114_s6 }
   0x8   :  { %156 = vmatpush3.bf16.msra.mxu0 %v155_v7  ;;  %p168_p0 = scmp.ne.s32.totalorder %s114_s6, %s167_s1  ;;  %p173_p2 = scmp.lt.s32.totalorder %s167_s1, %s167_s1 }
   0x9   :  { %157 = vmatprep.subr.bf16.mxu0 %v191_v3 }
   0xa   :  { %p174_p3 = por %p173_p2, %p172_p1 }
   0xc   :  { %159 = vmatpush3.bf16.msra.mxu0 %v158_v10  ;;  %p175_p4 = pnand %p174_p3, %p168_p0 }
   0xd   :  { %160 = vmatprep.subr.bf16.mxu0 %v191_v3 }
  0x10   :  { %162 = vmatpush3.bf16.msra.mxu0 %v161_v13 }
  0x13   :  { %149 = vmatmul.mubr.msk.f32.vlgmr.msra.gmra.mrb[0].mxu0 %vm31_vm1, %v15_v14 }
  0xe6   :  { %v101_v16 = vpop.f32.mrb[0].mxu0 }
  0xe7   :  { %v102_v17 = vadd.f32 %v121_v15, %v101_v16  ;;  %v150_v18 = vpop.f32.mrb[1].mxu0 }
  0xe9   :  { %106 = vst.msk [vmem:[#allocation2] sm:$0x3] %vm105_vm2, %v102_v17 }
  0xea   :  { %178 = shalt.err (!%p175_p4)
}
  0xeb   :  { %s179_s8 = scalar_lea.hbm %s260_s3, 32 }
  0xec   :  { %p180_p5 = scmp.ne.s32.totalorder %s260_s3, %s179_s8  ;;  %p183_p6 = scmp.lt.u32.totalorder %s179_s8, %s260_s3 }
  0xee   :  { %p185_p7 = pnand %p183_p6, %p180_p5 }
  0xf0   :  { %188 = shalt.err (!%p185_p7)
}
  0xf1   :  { %116 = dma.vmem_to_hbm [thread:$0]  %s114_s6, 32, %s260_s3, [#allocation3]  }
  0xf2   :  { %189 = dma.done.wait [#allocation3], 32  }
  0xf3   :  { %190 = vsyncadd [#allocation3], 4294967264 }
  0xf4   :  { %120 = vsyncpa [#allocation3], 1 }

</bundles_post_ra>
